<compile_context>
chip_gen: v7x
topology: tpu7x:2x2x1
jax: 0.10.0
libtpu: 0.0.40
codegen_flags: <defaults>
</compile_context>

<pallas_src>
import jax
import jax.numpy as jnp
from jax.experimental import pallas as pl
from jax.experimental.pallas import tpu as pltpu


def bahdanau_kernel(wd_ref, enc_ref, uwT_ref, vw_ref, ctx_ref, wts_ref):
    # wd_ref  : (TB, H)      hoisted W(dec) + b_W + b_U for this batch tile
    # enc_ref : (S, TB, H)   encoder outputs, native PyTorch (S, B, H) layout
    # uwT_ref : (H, H)       U weight, pre-transposed (x @ U.T == x @ uwT)
    # vw_ref  : (1, H)       V weight (output dim 1); V bias dropped (softmax-invariant)
    # ctx_ref : (TB, H)      context output
    # wts_ref : (S, TB, 1)   attention weights, already in PyTorch (S, B, 1) layout
    S, TB, H = enc_ref.shape

    enc = enc_ref[...]                                              # (S, TB, H)

    # U(encoder_output): one (S*TB, H) @ (H, H) MXU matmul.  TB is a multiple of
    # 8 (sublane tile), so the merge/split reshapes are layout no-ops in VMEM.
    ue = jnp.dot(enc.reshape(S * TB, H), uwT_ref[...],
                 preferred_element_type=jnp.float32).reshape(S, TB, H)

    # tanh(W(dec) + b_W + b_U + U(enc)); the decoder projection was hoisted to
    # the wrapper (one XLA matmul for the whole batch).
    e = jnp.tanh(wd_ref[...][None, :, :] + ue)                      # (S, TB, H)

    # V projection (output dim 1) == lane reduction over H.  Vb omitted: the
    # softmax over S is shift-invariant, so it cannot affect weights/context.
    score = jnp.sum(e * vw_ref[...][None, :, :], axis=-1,
                    keepdims=True)                                   # (S, TB, 1)

    # Softmax over the sequence axis (PyTorch F.softmax default dim=0 for 3-D).
    m = jnp.max(score, axis=0, keepdims=True)                        # (1, TB, 1)
    ex = jnp.exp(score - m)                                          # (S, TB, 1)
    denom = jnp.sum(ex, axis=0, keepdims=True)                       # (1, TB, 1)
    w = ex * (1.0 / denom)        # exact divide on the tiny denom -> sums to 1
    wts_ref[...] = w.astype(wts_ref.dtype)

    # context[b] = sum_s w[s, b] * enc[s, b, :]  -- VPU multiply + reduce over S
    # (no M=1 batched MXU matmuls).
    ctx_ref[...] = jnp.sum(w * enc, axis=0).astype(ctx_ref.dtype)


def _vmem_capacity_bytes():
    """Per-core VMEM capacity, with a conservative (v7x) fallback."""
    try:
        info = pltpu.get_tpu_info()
        for name in ("vmem_capacity_bytes", "vmem_bytes", "vmem_capacity"):
            v = getattr(info, name, None)
            if v:
                return int(v)
    except Exception:
        pass
    return 64 * 1024 * 1024


def _choose_batch_tile(Bp, S, H, budget_bytes):
    """Largest multiple-of-8 divisor of Bp whose VMEM working set fits."""
    row_bytes = -(-H // 128) * 128 * 4            # f32, H lane-padded to 128

    def fits(tb):
        rows = S * tb
        enc_tile = rows * row_bytes               # encoder block
        wts_tile = rows * 128 * 4                 # (S, TB, 1) block lane-pads 1 -> 128
        # enc double-buffered (x2) + ~2 tile-sized f32 temporaries (ue, e)
        # + weights block double-buffered.
        return 4 * enc_tile + 2 * wts_tile <= budget_bytes

    cands = [d for d in range(8, Bp + 1, 8) if Bp % d == 0 and fits(d)]
    if not cands:
        return min(8, Bp)                         # smallest legal tile
    tb = max(cands)
    # Keep >= 2 grid blocks for v7x's second TensorCore when we can do so while
    # staying above the ~512-sublane-row HBM-roofline knee.
    if Bp // tb < 2:
        multi = [d for d in cands if Bp // d >= 2 and d * S >= 512]
        if multi:
            tb = max(multi)
    return tb


def bahdanau_attention(decoder_hidden, encoder_output, params):
    """decoder_hidden: (B, H) f32; encoder_output: (S, B, H) f32."""
    Ww, Wb, Uw, Ub, Vw, Vb = params
    del Vb  # uniform shift of the pre-softmax score: cancels in softmax & context
    B, H = decoder_hidden.shape
    S = encoder_output.shape[0]

    # Hoisted decoder projection, with U's bias folded in (added once per batch
    # row instead of once per (s, b) element inside the kernel).
    wd_all = decoder_hidden @ Ww.T + (Wb + Ub)                      # (B, H)

    # Pad the batch to a sublane multiple only when B % 8 != 0; this is the only
    # case in which the encoder is copied.  No transpose anywhere: the kernel
    # consumes the native (S, B, H) layout directly.
    Bp = -(-B // 8) * 8
    enc = encoder_output
    if Bp > B:
        pad = Bp - B
        wd_all = jnp.pad(wd_all, ((0, pad), (0, 0)))
        enc = jnp.pad(enc, ((0, 0), (0, pad), (0, 0)))

    vmem_cap = _vmem_capacity_bytes()
    TB = _choose_batch_tile(Bp, S, H, budget_bytes=(vmem_cap * 3) // 8)
    nblk = Bp // TB

    uwT = Uw.T                                                       # (H, H)
    vw2 = Vw.reshape(1, H)

    ctx, wts = pl.pallas_call(
        bahdanau_kernel,
        out_shape=(
            jax.ShapeDtypeStruct((Bp, H), jnp.float32),              # context
            jax.ShapeDtypeStruct((S, Bp, 1), jnp.float32),           # weights (PyTorch layout)
        ),
        grid_spec=pl.GridSpec(
            grid=(nblk,),
            in_specs=[
                pl.BlockSpec((TB, H), lambda i: (i, 0)),             # W(dec)+b_W+b_U
                pl.BlockSpec((S, TB, H), lambda i: (0, i, 0)),       # encoder tile
                pl.BlockSpec((H, H), lambda i: (0, 0)),              # U^T
                pl.BlockSpec((1, H), lambda i: (0, 0)),              # V weight
            ],
            out_specs=(
                pl.BlockSpec((TB, H), lambda i: (i, 0)),             # context
                pl.BlockSpec((S, TB, 1), lambda i: (0, i, 0)),       # weights
            ),
        ),
        compiler_params=pltpu.CompilerParams(
            dimension_semantics=("parallel",),
            vmem_limit_bytes=int(min((vmem_cap * 3) // 4, 96 * 1024 * 1024)),
        ),
    )(wd_all, enc, uwT, vw2)

    context = ctx[:B]                                                # (B, H)
    weights = wts[:, :B, :]                                          # (S, B, 1)
    return context, weights


def bahdanau_reference(decoder_hidden, encoder_output, params):
    """Pure-JAX reference mirroring the PyTorch forward exactly."""
    Ww, Wb, Uw, Ub, Vw, Vb = params
    dec = decoder_hidden[None, ...]                                  # (1, B, H)
    wd = dec @ Ww.T + Wb                                             # (1, B, H)
    ue = encoder_output @ Uw.T + Ub                                  # (S, B, H)
    score = jnp.tanh(wd + ue) @ Vw.T + Vb                            # (S, B, 1)
    weights = jax.nn.softmax(score, axis=0)                          # dim=0 for 3-D
    context = jnp.sum(weights * encoder_output, axis=0)              # (B, H)
    return context, weights


def init_params(key, hidden_size):
    """Deterministic nn.Linear-style init: U(-1/sqrt(fan_in), 1/sqrt(fan_in))."""
    ks = jax.random.split(key, 6)
    bound = 1.0 / jnp.sqrt(hidden_size)
    Ww = jax.random.uniform(ks[0], (hidden_size, hidden_size), jnp.float32, -bound, bound)
    Wb = jax.random.uniform(ks[1], (hidden_size,), jnp.float32, -bound, bound)
    Uw = jax.random.uniform(ks[2], (hidden_size, hidden_size), jnp.float32, -bound, bound)
    Ub = jax.random.uniform(ks[3], (hidden_size,), jnp.float32, -bound, bound)
    Vw = jax.random.uniform(ks[4], (1, hidden_size), jnp.float32, -bound, bound)
    Vb = jax.random.uniform(ks[5], (1,), jnp.float32, -bound, bound)
    return (Ww, Wb, Uw, Ub, Vw, Vb)


if __name__ == "__main__":
    B, S, H = 2, 8, 32
    key = jax.random.PRNGKey(0)
    k_dec, k_enc, k_par = jax.random.split(key, 3)

    decoder_hidden = jax.random.normal(k_dec, (B, H), jnp.float32)
    encoder_output = jax.random.normal(k_enc, (S, B, H), jnp.float32)
    params = init_params(k_par, H)

    context, weights = bahdanau_attention(decoder_hidden, encoder_output, params)
    context = jax.block_until_ready(context)
    weights = jax.block_until_ready(weights)

    ref_ctx, ref_w = bahdanau_reference(decoder_hidden, encoder_output, params)

    assert context.shape == (B, H)
    assert weights.shape == (S, B, 1)
    assert jnp.allclose(context, ref_ctx, rtol=2e-3, atol=2e-3)
    assert jnp.allclose(weights, ref_w, rtol=2e-3, atol=2e-3)

    print("KERNEL_OK")
</pallas_src>

<mosaic_0001>
module attributes {stable_mosaic.version = 11 : i64} {
  func.func @bahdanau_kernel(%arg0: i32, %arg1: memref<8x32xf32, #tpu.memory_space<vmem>>, %arg2: memref<8x8x32xf32, #tpu.memory_space<vmem>>, %arg3: memref<32x32xf32, #tpu.memory_space<vmem>>, %arg4: memref<1x32xf32, #tpu.memory_space<vmem>>, %arg5: memref<8x32xf32, #tpu.memory_space<vmem>>, %arg6: memref<8x8x1xf32, #tpu.memory_space<vmem>>) attributes {dimension_semantics = [#tpu.dimension_semantics<parallel>], iteration_bounds = array<i64: 1>, scalar_prefetch = 0 : i64, scratch_operands = 0 : i64, tpu.core_type = #tpu.core_type<tc>, window_params = [{transform_indices = @transform_0, window_bounds = array<i64: 8, 32>}, {transform_indices = @transform_1, window_bounds = array<i64: 8, 8, 32>}, {pipeline_mode = #tpu.pipeline_mode<synchronous>, transform_indices = @transform_2, window_bounds = array<i64: 32, 32>}, {pipeline_mode = #tpu.pipeline_mode<synchronous>, transform_indices = @transform_3, window_bounds = array<i64: 1, 32>}, {transform_indices = @transform_4, window_bounds = array<i64: 8, 32>}, {transform_indices = @transform_5, window_bounds = array<i64: 8, 8, 1>}]} {
    %c0 = arith.constant 0 : index
    %c0_0 = arith.constant 0 : index
    %c0_1 = arith.constant 0 : index
    %0 = vector.load %arg2[%c0, %c0_0, %c0_1] : memref<8x8x32xf32, #tpu.memory_space<vmem>>, vector<8x8x32xf32>
    %1 = vector.shape_cast %0 : vector<8x8x32xf32> to vector<64x32xf32>
    %c0_2 = arith.constant 0 : index
    %c0_3 = arith.constant 0 : index
    %2 = vector.load %arg3[%c0_2, %c0_3] : memref<32x32xf32, #tpu.memory_space<vmem>>, vector<32x32xf32>
    %cst = arith.constant dense<0.000000e+00> : vector<64x32xf32>
    %3 = tpu.matmul %1, %2, %cst {dimension_numbers = #tpu.dot_dimension_numbers<[1], [0], [0], [1], [0, 0, 1, 1], [], []>} : vector<64x32xf32>, vector<32x32xf32>, vector<64x32xf32> -> vector<64x32xf32>
    %4 = vector.shape_cast %3 : vector<64x32xf32> to vector<8x8x32xf32>
    %c0_4 = arith.constant 0 : index
    %c0_5 = arith.constant 0 : index
    %5 = vector.load %arg1[%c0_4, %c0_5] : memref<8x32xf32, #tpu.memory_space<vmem>>, vector<8x32xf32>
    %6 = vector.shape_cast %5 : vector<8x32xf32> to vector<1x8x32xf32>
    %7 = vector.broadcast %6 : vector<1x8x32xf32> to vector<8x8x32xf32>
    %8 = arith.addf %7, %4 : vector<8x8x32xf32>
    %9 = math.tanh %8 : vector<8x8x32xf32>
    %c0_6 = arith.constant 0 : index
    %c0_7 = arith.constant 0 : index
    %10 = vector.load %arg4[%c0_6, %c0_7] : memref<1x32xf32, #tpu.memory_space<vmem>>, vector<1x32xf32>
    %11 = vector.shape_cast %10 : vector<1x32xf32> to vector<1x1x32xf32>
    %12 = vector.broadcast %11 : vector<1x1x32xf32> to vector<8x8x32xf32>
    %13 = arith.mulf %9, %12 : vector<8x8x32xf32>
    %cst_8 = arith.constant dense<0.000000e+00> : vector<8x8xf32>
    %14 = vector.multi_reduction <add>, %13, %cst_8 [2] : vector<8x8x32xf32> to vector<8x8xf32>
    %15 = vector.shape_cast %14 : vector<8x8xf32> to vector<8x8x1xf32>
    %cst_9 = arith.constant dense<0xFF800000> : vector<8x1xf32>
    %16 = vector.multi_reduction <maximumf>, %15, %cst_9 [0] : vector<8x8x1xf32> to vector<8x1xf32>
    %17 = vector.shape_cast %16 : vector<8x1xf32> to vector<1x8x1xf32>
    %18 = vector.broadcast %17 : vector<1x8x1xf32> to vector<8x8x1xf32>
    %19 = arith.subf %15, %18 : vector<8x8x1xf32>
    %20 = math.exp %19 : vector<8x8x1xf32>
    %cst_10 = arith.constant dense<0.000000e+00> : vector<8x1xf32>
    %21 = vector.multi_reduction <add>, %20, %cst_10 [0] : vector<8x8x1xf32> to vector<8x1xf32>
    %22 = vector.shape_cast %21 : vector<8x1xf32> to vector<1x8x1xf32>
    %cst_11 = arith.constant 1.000000e+00 : f32
    %23 = vector.broadcast %cst_11 : f32 to vector<1x8x1xf32>
    %24 = arith.divf %23, %22 : vector<1x8x1xf32>
    %25 = vector.broadcast %24 : vector<1x8x1xf32> to vector<8x8x1xf32>
    %26 = arith.mulf %20, %25 : vector<8x8x1xf32>
    %c0_12 = arith.constant 0 : index
    %c0_13 = arith.constant 0 : index
    %c0_14 = arith.constant 0 : index
    %27 = vector.load %arg6[%c0_12, %c0_13, %c0_14] : memref<8x8x1xf32, #tpu.memory_space<vmem>>, vector<8x8x1xf32>
    tpu.vector_store %arg6[%c0_12, %c0_13, %c0_14], %26 {strides = array<i32>} : memref<8x8x1xf32, #tpu.memory_space<vmem>>, vector<8x8x1xf32>,
    %28 = vector.broadcast %26 : vector<8x8x1xf32> to vector<8x8x32xf32>
    %29 = arith.mulf %28, %0 : vector<8x8x32xf32>
    %cst_15 = arith.constant dense<0.000000e+00> : vector<8x32xf32>
    %30 = vector.multi_reduction <add>, %29, %cst_15 [0] : vector<8x8x32xf32> to vector<8x32xf32>
    %c0_16 = arith.constant 0 : index
    %c0_17 = arith.constant 0 : index
    %31 = vector.load %arg5[%c0_16, %c0_17] : memref<8x32xf32, #tpu.memory_space<vmem>>, vector<8x32xf32>
    tpu.vector_store %arg5[%c0_16, %c0_17], %30 {strides = array<i32>} : memref<8x32xf32, #tpu.memory_space<vmem>>, vector<8x32xf32>,
    return
  }
  func.func @transform_0(%arg0: i32) -> (i32, i32) {
    %c0_i32 = arith.constant 0 : i32
    %c0_i32_0 = arith.constant 0 : i32
    return %arg0, %c0_i32 : i32, i32
  }
  func.func @transform_1(%arg0: i32) -> (i32, i32, i32) {
    %c0_i32 = arith.constant 0 : i32
    %c0_i32_0 = arith.constant 0 : i32
    %c0_i32_1 = arith.constant 0 : i32
    return %c0_i32, %arg0, %c0_i32_0 : i32, i32, i32
  }
  func.func @transform_2(%arg0: i32) -> (i32, i32) {
    %c0_i32 = arith.constant 0 : i32
    %c0_i32_0 = arith.constant 0 : i32
    %c0_i32_1 = arith.constant 0 : i32
    return %c0_i32, %c0_i32_0 : i32, i32
  }
  func.func @transform_3(%arg0: i32) -> (i32, i32) {
    %c0_i32 = arith.constant 0 : i32
    %c0_i32_0 = arith.constant 0 : i32
    %c0_i32_1 = arith.constant 0 : i32
    return %c0_i32, %c0_i32_0 : i32, i32
  }
  func.func @transform_4(%arg0: i32) -> (i32, i32) {
    %c0_i32 = arith.constant 0 : i32
    %c0_i32_0 = arith.constant 0 : i32
    return %arg0, %c0_i32 : i32, i32
  }
  func.func @transform_5(%arg0: i32) -> (i32, i32, i32) {
    %c0_i32 = arith.constant 0 : i32
    %c0_i32_0 = arith.constant 0 : i32
    %c0_i32_1 = arith.constant 0 : i32
    return %c0_i32, %arg0, %c0_i32_0 : i32, i32, i32
  }
}

</mosaic_0001>

<bundles_post_ra>
// kernel: tpu_custom_call.1
= control target key start
LH: loop header
LB: loop body
LE: loop exit
PB: predicated region body
PF: predicated region fallthrough
CT: control target
= control target key end

     0   :  { %11 = vsyncpa [#allocation3], 0  ;;  %s727_s0 = inlined_call_operand.hbm [shape: f32[8,32], index: 0, kind: input, shape index: {}]   ;;  %s728_s1 = inlined_call_operand.hbm [shape: f32[8,8,32], index: 1, kind: input, shape index: {}]   ;;  %s729_s2 = inlined_call_operand.hbm [shape: f32[32,32], index: 2, kind: input, shape index: {}]   ;;  %s730_s3 = inlined_call_operand.vmem [shape: f32[1,32], index: 3, kind: input, shape index: {}]   ;;  %s731_s4 = inlined_call_operand.hbm [shape: f32[8,32], index: 4, kind: output, shape index: {0}]   ;;  %s732_s5 = inlined_call_operand.vmem [shape: f32[8,8,1], index: 5, kind: output, shape index: {1}]  }
   0x1   :  { %12 = vsyncpa [#allocation6], 0 }
   0x2   :  { %13 = vsyncpa [#allocation4], 0  ;;  %s545_s18 = smov [#allocation5]   ;;  %s451_s22 = scalar_lea.hbm %s728_s1, 1024 }
   0x3   :  { %s29_s19 = sshll.u32 %s545_s18, 4  ;;  %p452_p0 = scmp.ne.s32.totalorder %s728_s1, %s451_s22  ;;  %s30_s19 = int_to_ptr.vmem [resolvable:$true] %s29_s19 }
   0x4   :  { %p455_p1 = scmp.lt.u32.totalorder %s451_s22, %s728_s1 }
   0x6   :  { %p457_p2 = pnand %p455_p1, %p452_p0 }
   0x8   :  { %460 = shalt.err (!%p457_p2)
}
   0x9   :  { %s461_s27 = scalar_lea.vmem %s30_s19, 1024  ;;  %p466_p4 = scmp.lt.s32.totalorder %s30_s19, %s30_s19 }
   0xa   :  { %p462_p3 = scmp.ne.s32.totalorder %s30_s19, %s461_s27  ;;  %p467_p5 = scmp.lt.s32.totalorder %s461_s27, %s461_s27 }
   0xc   :  { %p468_p6 = por %p467_p5, %p466_p4 }
   0xe   :  { %p469_p7 = pnand %p468_p6, %p462_p3 }
  0x10   :  { %472 = shalt.err (!%p469_p7)
}
  0x11   :  { %s546_s28 = smov 128   ;;  %s547_s29 = smov 8  }
  0x12   :  { %35 = dma.hbm_to_vmem [thread:$0]  %s728_s1, 1024, %s30_s19, [#allocation6], %s546_s28, %s546_s28, %s547_s29  }
  0x13   :  { %s548_s7 = smov [#allocation2]   ;;  %s549_s9 = smov [#allocation7]  }
  0x14   :  { %s20_s8 = sshll.u32 %s548_s7, 4  ;;  %s41_s10 = sshll.u32 %s549_s9, 4  ;;  %s21_s8 = int_to_ptr.vmem [resolvable:$true] %s20_s8  ;;  %s42_s10 = int_to_ptr.vmem [resolvable:$true] %s41_s10 }
  0x15   :  { %s473_s13 = scalar_lea.hbm %s727_s0, 128 }
  0x16   :  { %p474_p8 = scmp.ne.s32.totalorder %s727_s0, %s473_s13  ;;  %p477_p9 = scmp.lt.u32.totalorder %s473_s13, %s727_s0 }
  0x18   :  { %p479_p10 = pnand %p477_p9, %p474_p8 }
  0x1a   :  { %482 = shalt.err (!%p479_p10)
}
  0x1b   :  { %s483_s1 = scalar_lea.vmem %s21_s8, 128  ;;  %p488_p12 = scmp.lt.s32.totalorder %s21_s8, %s21_s8 }
  0x1c   :  { %p484_p11 = scmp.ne.s32.totalorder %s21_s8, %s483_s1  ;;  %p489_p13 = scmp.lt.s32.totalorder %s483_s1, %s483_s1 }
  0x1e   :  { %p490_p0 = por %p489_p13, %p488_p12 }
  0x20   :  { %p491_p1 = pnand %p490_p0, %p484_p11 }
  0x22   :  { %494 = shalt.err (!%p491_p1)
}
  0x23   :  { %23 = dma.hbm_to_vmem [thread:$0]  %s727_s0, 128, %s21_s8, [#allocation3]  }
  0x24   :  { %s495_s22 = scalar_lea.hbm %s729_s2, 512 }
  0x25   :  { %p496_p2 = scmp.ne.s32.totalorder %s729_s2, %s495_s22  ;;  %p499_p3 = scmp.lt.u32.totalorder %s495_s22, %s729_s2 }
  0x27   :  { %p501_p4 = pnand %p499_p3, %p496_p2 }
  0x29   :  { %504 = shalt.err (!%p501_p4)
}
  0x2a   :  { %s505_s27 = scalar_lea.vmem %s42_s10, 512  ;;  %p510_p6 = scmp.lt.s32.totalorder %s42_s10, %s42_s10 }
  0x2b   :  { %p506_p5 = scmp.ne.s32.totalorder %s42_s10, %s505_s27  ;;  %p511_p7 = scmp.lt.s32.totalorder %s505_s27, %s505_s27 }
  0x2d   :  { %p512_p8 = por %p511_p7, %p510_p6 }
  0x2f   :  { %p513_p9 = pnand %p512_p8, %p506_p5 }
  0x31   :  { %516 = shalt.err (!%p513_p9)
}
  0x32   :  { %47 = dma.hbm_to_vmem [thread:$0]  %s729_s2, 512, %s42_s10, [#allocation6], %s546_s28, %s546_s28, %s547_s29  }
  0x33   :  { %539 = dma.done.wait [#allocation3], 128  }
  0x34   :  { %540 = vsyncadd [#allocation3], 4294967168 }
  0x35   :  { %541 = dma.done.wait [#allocation6], 1536  }
  0x36   :  { %542 = vsyncadd [#allocation6], 4294965760  ;;  %vm71_vm0 = vcmask 261120   ;;  %v67_v0 = vld [vmem:[#allocation7] sm:$0xff]  ;;  %v68_v1 = vld [vmem:[#allocation7 + $0x8] sm:$0xff]  ;;  %vm305_vm1 = vcmask 7168  }
  0x37   :  { %v69_v2 = vld [vmem:[#allocation7 + $0x10] sm:$0xff]  ;;  %v399_v3 = vpack.c.bf16 %v68_v1, %v67_v0  ;;  %v70_v4 = vld [vmem:[#allocation7 + $0x18] sm:$0xff]  ;;  %v623_v5 = vld [vmem:[#allocation5] sm:$0xff] }
  0x38   :  { %v625_v6 = vld [vmem:[#allocation5 + $0x20] sm:$0xff]  ;;  %v403_v7 = vpack.c.bf16 %v70_v4, %v69_v2  ;;  %387 = vmatprep.mubr.msk.f32.mxu0 %vm71_vm0, %v623_v5  ;;  %v631_v8 = vld [vmem:[#allocation5 + $0x8] sm:$0xff]  ;;  %v635_v10 = vld [vmem:[#allocation5 + $0x10] sm:$0xff] }
  0x39   :  { %393 = vmatprep.mubr.msk.f32.mxu1 %vm71_vm0, %v625_v6  ;;  %400 = vmatprep.subr.bf16.mxu0 %v399_v3  ;;  %v633_v9 = vld [vmem:[#allocation5 + $0x28] sm:$0xff]  ;;  %v637_v11 = vld [vmem:[#allocation5 + $0x30] sm:$0xff]  ;;  %v645_v12 = vld [vmem:[#allocation5 + $0x18] sm:$0xff] }
  0x3a   :  { %407 = vmatprep.subr.bf16.mxu1 %v399_v3  ;;  %402 = vmatpush3.bf16.msra.mxu0 %v399_v3  ;;  %v649_v13 = vld [vmem:[#allocation5 + $0x38] sm:$0xff] }
  0x3b   :  { %409 = vmatpush3.bf16.msra.mxu1 %v399_v3  ;;  %404 = vmatprep.subr.bf16.mxu0 %v403_v7  ;;  %v201_v14 = vld [vmem:[#allocation2] sm:$0xff] }
  0x3c   :  { %408 = vmatprep.subr.bf16.mxu1 %v403_v7  ;;  %v366_v31 = vld [vmem:[%s730_s3] ss:$0 sm:$0xff] }
  0x3e   :  { %406 = vmatpush3.bf16.msra.mxu0 %v403_v7 }
  0x3f   :  { %410 = vmatpush3.bf16.msra.mxu1 %v403_v7 }
  0x41   :  { %388 = vmatmul.mubr.msk.f32.vlgmr.msra.gmra.mrb[0].mxu0 %vm71_vm0, %v631_v8 }
  0x42   :  { %394 = vmatmul.mubr.msk.f32.vlgmr.msra.gmra.mrb[0].mxu1 %vm71_vm0, %v633_v9  ;;  %390 = vmatprep.mubr.msk.f32.mxu0 %vm71_vm0, %v635_v10 }
  0x43   :  { %396 = vmatprep.mubr.msk.f32.mxu1 %vm71_vm0, %v637_v11 }
  0x45   :  { %391 = vmatmul.mubr.msk.f32.gmra.mrb[2].mxu0 %vm71_vm0, %v645_v12 }
  0x46   :  { %397 = vmatmul.mubr.msk.f32.gmra.mrb[2].mxu1 %vm71_vm0, %v649_v13 }
 0x114   :  { %v389_v15 = vpop.f32.mrb[0].mxu0 }
 0x115   :  { %v395_v16 = vpop.f32.mrb[0].mxu1  ;;  %v203_v17 = vadd.f32 %v389_v15, %v201_v14  ;;  %v162_v19 = vpop.f32.mrb[1].mxu0 }
 0x116   :  { %v207_v18 = vadd.f32 %v395_v16, %v201_v14  ;;  %v182_v20 = vpop.f32.mrb[1].mxu1  ;;  %v202_v21 = vadd.f32 %v201_v14, %v162_v19 }
 0x117   :  { %v206_v22 = vadd.f32 %v201_v14, %v182_v20  ;;  %417 = vtanh.f32 %v203_v17 }
 0x118   :  { %419 = vtanh.f32 %v207_v18  ;;  %v392_v23 = vpop.f32.mrb[2].mxu0 }
 0x119   :  { %v398_v24 = vpop.f32.mrb[2].mxu1  ;;  %421 = vtanh.f32 %v202_v21  ;;  %v205_v25 = vadd.f32 %v392_v23, %v201_v14  ;;  %v172_v26 = vpop.f32.mrb[3].mxu0 }
 0x11a   :  { %v209_v27 = vadd.f32 %v398_v24, %v201_v14  ;;  %v192_v28 = vpop.f32.mrb[3].mxu1  ;;  %423 = vtanh.f32 %v206_v22  ;;  %v204_v29 = vadd.f32 %v201_v14, %v172_v26 }
 0x11b   :  { %v208_v30 = vadd.f32 %v201_v14, %v192_v28  ;;  %425 = vtanh.f32 %v205_v25 }
 0x11c   :  { %427 = vtanh.f32 %v204_v29 }
 0x11d   :  { %429 = vtanh.f32 %v209_v27 }
 0x11e   :  { %431 = vtanh.f32 %v208_v30 }
 0x121   :  { %v418_v32 = vpop.eup %417 }
 0x122   :  { %v420_v33 = vpop.eup %419  ;;  %v226_v34 = vmul.f32 %v418_v32, %v366_v31 }
 0x123   :  { %v422_v35 = vpop.eup %421  ;;  %v230_v36 = vmul.f32 %v420_v33, %v366_v31 }
 0x124   :  { %v424_v37 = vpop.eup %423  ;;  %v236_v38 = vsel %vm71_vm0, %v226_v34, 0.0  ;;  %v225_v39 = vmul.f32 %v422_v35, %v366_v31 }
 0x125   :  { %v426_v40 = vpop.eup %425  ;;  %v248_v41 = vsel %vm71_vm0, %v230_v36, 0.0  ;;  %237 = vadd.xlane.f32.xlu0 %v236_v38  ;;  %v229_v48 = vmul.f32 %v424_v37, %v366_v31 }
 0x126   :  { %v428_v42 = vpop.eup %427  ;;  %249 = vadd.xlane.f32.xlu1 %v248_v41  ;;  %v228_v43 = vmul.f32 %v426_v40, %v366_v31  ;;  %v233_v46 = vsel %vm71_vm0, %v225_v39, 0.0 }
 0x127   :  { %v430_v44 = vpop.eup %429  ;;  %v227_v49 = vmul.f32 %v428_v42, %v366_v31  ;;  %v245_v52 = vsel %vm71_vm0, %v229_v48, 0.0 }
 0x128   :  { %v432_v45 = vpop.eup %431  ;;  %v242_v47 = vsel %vm71_vm0, %v228_v43, 0.0  ;;  %v232_v51 = vmul.f32 %v430_v44, %v366_v31 }
 0x129   :  { %234 = vadd.xlane.f32.xlu0 %v233_v46  ;;  %v231_v50 = vmul.f32 %v432_v45, %v366_v31  ;;  %v239_v53 = vsel %vm71_vm0, %v227_v49, 0.0 }
 0x12a   :  { %243 = vadd.xlane.f32.xlu1 %v242_v47  ;;  %v254_v55 = vsel %vm71_vm0, %v232_v51, 0.0 }
 0x12b   :  { %v251_v54 = vsel %vm71_vm0, %v231_v50, 0.0 }
 0x12d   :  { %246 = vadd.xlane.f32.xlu0 %v245_v52 }
 0x12e   :  { %240 = vadd.xlane.f32.xlu1 %v239_v53 }
 0x131   :  { %252 = vadd.xlane.f32.xlu0 %v251_v54 }
 0x132   :  { %255 = vadd.xlane.f32.xlu1 %v254_v55 }
 0x1b2   :  { %v238_v56 = vpop.xlane.xlu0 %237 }
 0x1b3   :  { %v250_v57 = vpop.xlane.xlu1 %249 }
 0x1b4   :  { %v258_v2 = vmax.f32 %v238_v56, %v250_v57 }
 0x1b6   :  { %v235_v58 = vpop.xlane.xlu0 %234 }
 0x1b7   :  { %v244_v59 = vpop.xlane.xlu1 %243 }
 0x1ba   :  { %v247_v60 = vpop.xlane.xlu0 %246 }
 0x1bb   :  { %v241_v61 = vpop.xlane.xlu1 %240  ;;  %v257_v62 = vmax.f32 %v235_v58, %v247_v60 }
 0x1bd   :  { %v261_v4 = vmax.f32 %v257_v62, %v258_v2 }
 0x1be   :  { %v253_v63 = vpop.xlane.xlu0 %252 }
 0x1bf   :  { %v259_v0 = vmax.f32 %v241_v61, %v253_v63  ;;  %v256_v1 = vpop.xlane.xlu1 %255 }
 0x1c0   :  { %v260_v3 = vmax.f32 %v244_v59, %v256_v1 }
 0x1c2   :  { %v262_v7 = vmax.f32 %v259_v0, %v260_v3 }
 0x1c4   :  { %v263_v14 = vmax.f32 %v261_v4, %v262_v7 }
 0x1c6   :  { %v264_v15 = vsub.f32 %v235_v58, %v263_v14  ;;  %v265_v16 = vsub.f32 %v238_v56, %v263_v14  ;;  %v266_v17 = vsub.f32 %v241_v61, %v263_v14  ;;  %v267_v18 = vsub.f32 %v244_v59, %v263_v14 }
 0x1c7   :  { %v268_v21 = vsub.f32 %v247_v60, %v263_v14  ;;  %v269_v23 = vsub.f32 %v250_v57, %v263_v14  ;;  %v270_v25 = vsub.f32 %v253_v63, %v263_v14  ;;  %v271_v27 = vsub.f32 %v256_v1, %v263_v14 }
 0x1c8   :  { %v272_v19 = vmul.f32 1.442695, %v264_v15  ;;  %v274_v20 = vmul.f32 1.442695, %v265_v16  ;;  %v276_v22 = vmul.f32 1.442695, %v266_v17 }
 0x1c9   :  { %v278_v24 = vmul.f32 1.442695, %v267_v18  ;;  %v280_v26 = vmul.f32 1.442695, %v268_v21  ;;  %v282_v28 = vmul.f32 1.442695, %v269_v23 }
 0x1ca   :  { %433 = vpow2.f32 %v272_v19  ;;  %v284_v29 = vmul.f32 1.442695, %v270_v25  ;;  %v286_v30 = vmul.f32 1.442695, %v271_v27 }
 0x1cb   :  { %435 = vpow2.f32 %v274_v20 }
 0x1cc   :  { %437 = vpow2.f32 %v276_v22 }
 0x1cd   :  { %439 = vpow2.f32 %v278_v24 }
 0x1ce   :  { %441 = vpow2.f32 %v280_v26 }
 0x1cf   :  { %443 = vpow2.f32 %v282_v28 }
 0x1d0   :  { %445 = vpow2.f32 %v284_v29 }
 0x1d1   :  { %447 = vpow2.f32 %v286_v30 }
 0x1d4   :  { %v434_v31 = vpop.eup %433 }
 0x1d5   :  { %v436_v32 = vpop.eup %435 }
 0x1d6   :  { %v288_v33 = vadd.f32 %v436_v32, %v434_v31  ;;  %v438_v34 = vpop.eup %437 }
 0x1d7   :  { %v440_v36 = vpop.eup %439 }
 0x1d8   :  { %v289_v35 = vadd.f32 %v438_v34, %v288_v33  ;;  %v442_v38 = vpop.eup %441 }
 0x1d9   :  { %v444_v40 = vpop.eup %443 }
 0x1da   :  { %v290_v37 = vadd.f32 %v440_v36, %v289_v35  ;;  %v446_v42 = vpop.eup %445 }
 0x1db   :  { %v448_v44 = vpop.eup %447 }
 0x1dc   :  { %v291_v39 = vadd.f32 %v442_v38, %v290_v37 }
 0x1de   :  { %v292_v41 = vadd.f32 %v444_v40, %v291_v39 }
 0x1e0   :  { %v293_v43 = vadd.f32 %v446_v42, %v292_v41 }
 0x1e2   :  { %v294_v45 = vadd.f32 %v448_v44, %v293_v43 }
 0x1e4   :  { %449 = vrcp.f32 %v294_v45 }
 0x1ee   :  { %v450_v46 = vpop.eup %449 }
 0x1ef   :  { %v297_v47 = vmul.f32 %v450_v46, %v434_v31  ;;  %v298_v48 = vmul.f32 %v450_v46, %v436_v32  ;;  %v299_v49 = vmul.f32 %v450_v46, %v438_v34  ;;  %v300_v50 = vmul.f32 %v450_v46, %v440_v36 }
 0x1f0   :  { %v301_v51 = vmul.f32 %v450_v46, %v442_v38  ;;  %v302_v52 = vmul.f32 %v450_v46, %v444_v40  ;;  %v303_v53 = vmul.f32 %v450_v46, %v446_v42  ;;  %v304_v54 = vmul.f32 %v450_v46, %v448_v44 }
 0x1f1   :  { %306 = vst.msk [vmem:[%s732_s5] sm:$0xff] %vm305_vm1, %v297_v47  ;;  %307 = vst.msk [vmem:[%s732_s5 + $0x8] sm:$0xff] %vm305_vm1, %v298_v48  ;;  %v314_v55 = vmul.f32 %v297_v47, %v623_v5  ;;  %v315_v56 = vmul.f32 %v298_v48, %v631_v8  ;;  %v316_v57 = vmul.f32 %v299_v49, %v635_v10 }
 0x1f2   :  { %308 = vst.msk [vmem:[%s732_s5 + $0x10] sm:$0xff] %vm305_vm1, %v299_v49  ;;  %309 = vst.msk [vmem:[%s732_s5 + $0x18] sm:$0xff] %vm305_vm1, %v300_v50  ;;  %v317_v5 = vmul.f32 %v300_v50, %v645_v12  ;;  %v318_v59 = vmul.f32 %v301_v51, %v625_v6  ;;  %v319_v62 = vmul.f32 %v302_v52, %v633_v9 }
 0x1f3   :  { %310 = vst.msk [vmem:[%s732_s5 + $0x20] sm:$0xff] %vm305_vm1, %v301_v51  ;;  %311 = vst.msk [vmem:[%s732_s5 + $0x28] sm:$0xff] %vm305_vm1, %v302_v52  ;;  %v322_v8 = vsel %vm71_vm0, %v314_v55, 0.0  ;;  %v323_v10 = vsel %vm71_vm0, %v315_v56, 0.0  ;;  %v325_v60 = vsel %vm71_vm0, %v316_v57, 0.0  ;;  %v320_v1 = vmul.f32 %v303_v53, %v637_v11 }
 0x1f4   :  { %312 = vst.msk [vmem:[%s732_s5 + $0x30] sm:$0xff] %vm305_vm1, %v303_v53  ;;  %313 = vst.msk [vmem:[%s732_s5 + $0x38] sm:$0xff] %vm305_vm1, %v304_v54  ;;  %v324_v58 = vadd.f32 %v323_v10, %v322_v8  ;;  %v327_v63 = vsel %vm71_vm0, %v317_v5, 0.0  ;;  %v329_v2 = vsel %vm71_vm0, %v318_v59, 0.0  ;;  %v321_v3 = vmul.f32 %v304_v54, %v649_v13  ;;  %s550_s5 = smov [#allocation8]  }
 0x1f5   :  { %v331_v4 = vsel %vm71_vm0, %v319_v62, 0.0  ;;  %v333_v6 = vsel %vm71_vm0, %v320_v1, 0.0  ;;  %s344_s19 = sshll.u32 %s550_s5, 4  ;;  %s345_s19 = int_to_ptr.vmem [resolvable:$true] %s344_s19 }
 0x1f6   :  { %v326_v61 = vadd.f32 %v325_v60, %v324_v58  ;;  %v335_v9 = vsel %vm71_vm0, %v321_v3, 0.0  ;;  %s517_s20 = scalar_lea.vmem %s345_s19, 128  ;;  %p522_p11 = scmp.lt.s32.totalorder %s345_s19, %s345_s19 }
 0x1f7   :  { %p518_p10 = scmp.ne.s32.totalorder %s345_s19, %s517_s20  ;;  %p523_p12 = scmp.lt.s32.totalorder %s517_s20, %s517_s20 }
 0x1f8   :  { %v328_v0 = vadd.f32 %v327_v63, %v326_v61 }
 0x1f9   :  { %p524_p13 = por %p523_p12, %p522_p11 }
 0x1fa   :  { %v330_v12 = vadd.f32 %v329_v2, %v328_v0 }
 0x1fb   :  { %p525_p0 = pnand %p524_p13, %p518_p10 }
 0x1fc   :  { %v332_v7 = vadd.f32 %v331_v4, %v330_v12 }
 0x1fe   :  { %v334_v14 = vadd.f32 %v333_v6, %v332_v7 }
 0x200   :  { %v336_v15 = vadd.f32 %v335_v9, %v334_v14 }
 0x202   :  { %337 = vst.msk [vmem:[#allocation8] sm:$0xff] %vm71_vm0, %v336_v15 }
 0x203   :  { %528 = shalt.err (!%p525_p0)
}
 0x204   :  { %s529_s23 = scalar_lea.hbm %s731_s4, 128 }
 0x205   :  { %p530_p1 = scmp.ne.s32.totalorder %s731_s4, %s529_s23  ;;  %p533_p2 = scmp.lt.u32.totalorder %s529_s23, %s731_s4 }
 0x207   :  { %p535_p3 = pnand %p533_p2, %p530_p1 }
 0x209   :  { %538 = shalt.err (!%p535_p3)
}
 0x20a   :  { %347 = dma.vmem_to_hbm [thread:$0]  %s345_s19, 128, %s731_s4, [#allocation4]  }
 0x20b   :  { %543 = dma.done.wait [#allocation4], 128  }
 0x20c   :  { %544 = vsyncadd [#allocation4], 4294967168 }
 0x20d   :  { %355 = vsyncpa [#allocation3], 1 }
 0x20e   :  { %356 = vsyncpa [#allocation6], 1 }
 0x20f   :  { %357 = vsyncpa [#allocation4], 1 }

</bundles_post_ra>
